<compile_context>
chip_gen: v7x
topology: tpu7x:2x2x1
jax: 0.10.0
libtpu: 0.0.40
codegen_flags: <defaults>
</compile_context>

<pallas_src>
import functools

import jax
import jax.numpy as jnp
from jax.experimental import pallas as pl
from jax.experimental.pallas import tpu as pltpu


def _mha_mean_kernel(x_ref, wqkv_ref, bqkv_ref, wo_ref, bo_ref, out_ref):
    TB, S, E = x_ref.shape

    # Flatten the batch tile so the QKV projection is one MXU-shaped matmul.
    x2 = x_ref[...].reshape(TB * S, E)                                   # (TB*S, E)

    # Packed projection: weights are pre-transposed (in, out) and Wq/bq are
    # pre-scaled by 1/sqrt(E) host-side.
    qkv = jnp.dot(x2, wqkv_ref[...], preferred_element_type=jnp.float32) # (TB*S, 3E)
    qkv = qkv + bqkv_ref[...]

    q = qkv[:, 0 * E:1 * E].reshape(TB, S, E)
    k = qkv[:, 1 * E:2 * E].reshape(TB, S, E)
    v = qkv[:, 2 * E:3 * E].reshape(TB, S, E)

    # Batched scaled dot-product attention (scale already folded into q).
    scores = jnp.einsum("bqd,bkd->bqk", q, k,
                        preferred_element_type=jnp.float32)              # (TB, S, S)

    # Numerically stable softmax over keys.
    m = jnp.max(scores, axis=-1, keepdims=True)
    e = jnp.exp(scores - m)
    p = e * pl.reciprocal(jnp.sum(e, axis=-1, keepdims=True), approx=True)

    attn = jnp.einsum("bqk,bkd->bqd", p, v,
                      preferred_element_type=jnp.float32)                # (TB, S, E)

    # mean over seq is linear -> fold it before the output projection.
    attn_mean = jnp.mean(attn, axis=1)                                   # (TB, E)

    out = jnp.dot(attn_mean, wo_ref[...],
                  preferred_element_type=jnp.float32) + bo_ref[...]      # (TB, E)
    out_ref[...] = out.astype(out_ref.dtype)


def multi_attention_forward(x, params, *, target_rows=256):
    """x: (B, S, E) f32 -> (B, E) f32  (MultiheadAttention(num_heads=1) + mean over S)."""
    B, S, E = x.shape
    wq, wk, wv = params["wq"], params["wk"], params["wv"]
    bq, bk, bv = params["bq"], params["bk"], params["bv"]
    wo, bo = params["wo"], params["bo"]

    # ---- host-side weight packing / layout (one-time, outside the kernel) ----
    scale = 1.0 / jnp.sqrt(jnp.float32(E))
    # pre-transpose to (in, out); fold 1/sqrt(E) into the Q projection.
    wqkv = jnp.concatenate([wq.T * scale, wk.T, wv.T], axis=1)           # (E, 3E)
    bqkv = jnp.concatenate([bq * scale, bk, bv], axis=1)                 # (1, 3E)
    wo_t = wo.T                                                          # (E, E)

    # ---- batch tiling: TB batch elements per grid step ----
    TB = max(1, min(B, target_rows // S))
    if TB < B:
        # keep output tiles sublane-dense when the batch axis is actually tiled
        TB = max(8, (TB // 8) * 8)
    Bp = pl.cdiv(B, TB) * TB
    if Bp != B:
        # zero-padded rows produce harmless garbage rows that we slice off below
        x = jnp.pad(x, ((0, Bp - B), (0, 0), (0, 0)))

    out = pl.pallas_call(
        _mha_mean_kernel,
        out_shape=jax.ShapeDtypeStruct((Bp, E), jnp.float32),
        grid_spec=pltpu.PrefetchScalarGridSpec(
            num_scalar_prefetch=0,
            grid=(Bp // TB,),
            in_specs=[
                pl.BlockSpec((TB, S, E), lambda b: (b, 0, 0)),   # x tile
                pl.BlockSpec((E, 3 * E), lambda b: (0, 0)),      # packed Wqkv (resident)
                pl.BlockSpec((1, 3 * E), lambda b: (0, 0)),      # packed bqkv
                pl.BlockSpec((E, E), lambda b: (0, 0)),          # Wo^T
                pl.BlockSpec((1, E), lambda b: (0, 0)),          # bo
            ],
            out_specs=pl.BlockSpec((TB, E), lambda b: (b, 0)),
        ),
        compiler_params=pltpu.CompilerParams(
            dimension_semantics=("parallel",)),
    )(x, wqkv, bqkv, wo_t, bo)

    return out[:B]


def init_params(key, embed_dim):
    ks = jax.random.split(key, 10)
    scale = 1.0 / jnp.sqrt(jnp.float32(embed_dim))
    u = functools.partial(jax.random.uniform, dtype=jnp.float32,
                          minval=-scale, maxval=scale)
    p = {
        "wq": u(ks[0], (embed_dim, embed_dim)),
        "wk": u(ks[1], (embed_dim, embed_dim)),
        "wv": u(ks[2], (embed_dim, embed_dim)),
        "bq": u(ks[3], (1, embed_dim)),
        "bk": u(ks[4], (1, embed_dim)),
        "bv": u(ks[5], (1, embed_dim)),
        "wo": u(ks[6], (embed_dim, embed_dim)),
        "bo": u(ks[7], (1, embed_dim)),
        # TODO(synk): self.fc exists in the PyTorch module but is unused in forward();
        # materialized for parameter-set parity only.
        "fc_w": u(ks[8], (embed_dim, embed_dim)),
        "fc_b": u(ks[9], (1, embed_dim)),
    }
    return p


def reference_forward(x, params):
    """Pure-JAX reference of the same math (single-head MHA + mean over seq)."""
    q = x @ params["wq"].T + params["bq"]
    k = x @ params["wk"].T + params["bk"]
    v = x @ params["wv"].T + params["bv"]
    E = x.shape[-1]
    scores = (q @ jnp.swapaxes(k, -1, -2)) / jnp.sqrt(jnp.float32(E))
    p = jax.nn.softmax(scores, axis=-1)
    attn = p @ v
    out = attn @ params["wo"].T + params["bo"]
    return jnp.mean(out, axis=1)


if __name__ == "__main__":
    B, S, E = 2, 8, 32
    key = jax.random.PRNGKey(0)
    kx, kp = jax.random.split(key)
    x = jax.random.normal(kx, (B, S, E), jnp.float32)
    params = init_params(kp, E)

    out = multi_attention_forward(x, params)
    out = jax.block_until_ready(out)

    ref = reference_forward(x, params)
    assert out.shape == (B, E)
    # tolerance loosened slightly: pl.reciprocal(approx=True) uses the EUP's
    # approximate reciprocal (~1e-4 relative error) in the softmax denominator.
    assert jnp.allclose(out, ref, atol=2e-3, rtol=2e-3), "mismatch vs reference"

    print("KERNEL_OK")
</pallas_src>

<mosaic_0001>
module attributes {stable_mosaic.version = 11 : i64} {
  func.func @_mha_mean_kernel(%arg0: i32, %arg1: memref<2x8x32xf32, #tpu.memory_space<vmem>>, %arg2: memref<32x96xf32, #tpu.memory_space<vmem>>, %arg3: memref<1x96xf32, #tpu.memory_space<vmem>>, %arg4: memref<32x32xf32, #tpu.memory_space<vmem>>, %arg5: memref<1x32xf32, #tpu.memory_space<vmem>>, %arg6: memref<2x32xf32, #tpu.memory_space<vmem>>) attributes {dimension_semantics = [#tpu.dimension_semantics<parallel>], iteration_bounds = array<i64: 1>, scalar_prefetch = 0 : i64, scratch_operands = 0 : i64, tpu.core_type = #tpu.core_type<tc>, window_params = [{transform_indices = @transform_0, window_bounds = array<i64: 2, 8, 32>}, {pipeline_mode = #tpu.pipeline_mode<synchronous>, transform_indices = @transform_1, window_bounds = array<i64: 32, 96>}, {pipeline_mode = #tpu.pipeline_mode<synchronous>, transform_indices = @transform_2, window_bounds = array<i64: 1, 96>}, {pipeline_mode = #tpu.pipeline_mode<synchronous>, transform_indices = @transform_3, window_bounds = array<i64: 32, 32>}, {pipeline_mode = #tpu.pipeline_mode<synchronous>, transform_indices = @transform_4, window_bounds = array<i64: 1, 32>}, {transform_indices = @transform_5, window_bounds = array<i64: 2, 32>}]} {
    %c0 = arith.constant 0 : index
    %c0_0 = arith.constant 0 : index
    %c0_1 = arith.constant 0 : index
    %0 = vector.load %arg1[%c0, %c0_0, %c0_1] : memref<2x8x32xf32, #tpu.memory_space<vmem>>, vector<2x8x32xf32>
    %1 = vector.shape_cast %0 : vector<2x8x32xf32> to vector<16x32xf32>
    %c0_2 = arith.constant 0 : index
    %c0_3 = arith.constant 0 : index
    %2 = vector.load %arg2[%c0_2, %c0_3] : memref<32x96xf32, #tpu.memory_space<vmem>>, vector<32x96xf32>
    %cst = arith.constant dense<0.000000e+00> : vector<16x96xf32>
    %3 = tpu.matmul %1, %2, %cst {dimension_numbers = #tpu.dot_dimension_numbers<[1], [0], [0], [1], [0, 0, 1, 1], [], []>} : vector<16x32xf32>, vector<32x96xf32>, vector<16x96xf32> -> vector<16x96xf32>
    %c0_4 = arith.constant 0 : index
    %c0_5 = arith.constant 0 : index
    %4 = vector.load %arg3[%c0_4, %c0_5] : memref<1x96xf32, #tpu.memory_space<vmem>>, vector<1x96xf32>
    %5 = vector.broadcast %4 : vector<1x96xf32> to vector<16x96xf32>
    %6 = arith.addf %3, %5 : vector<16x96xf32>
    %7 = vector.extract_strided_slice %6 {offsets = [0, 0], sizes = [16, 32], strides = [1, 1]} : vector<16x96xf32> to vector<16x32xf32>
    %8 = vector.shape_cast %7 : vector<16x32xf32> to vector<2x8x32xf32>
    %9 = vector.extract_strided_slice %6 {offsets = [0, 32], sizes = [16, 32], strides = [1, 1]} : vector<16x96xf32> to vector<16x32xf32>
    %10 = vector.shape_cast %9 : vector<16x32xf32> to vector<2x8x32xf32>
    %11 = vector.extract_strided_slice %6 {offsets = [0, 64], sizes = [16, 32], strides = [1, 1]} : vector<16x96xf32> to vector<16x32xf32>
    %12 = vector.shape_cast %11 : vector<16x32xf32> to vector<2x8x32xf32>
    "tpu.trace_start"() <{level = 10 : i32, message = "bqd,bkd->bqk"}> : () -> ()
    %cst_6 = arith.constant dense<0.000000e+00> : vector<2x8x8xf32>
    %13 = tpu.matmul %8, %10, %cst_6 {dimension_numbers = #tpu.dot_dimension_numbers<[2], [2], [1], [1], [0, 0, 0, 1, 1, 1], [0], [0]>} : vector<2x8x32xf32>, vector<2x8x32xf32>, vector<2x8x8xf32> -> vector<2x8x8xf32>
    "tpu.trace_stop"() : () -> ()
    %cst_7 = arith.constant dense<0xFF800000> : vector<2x8xf32>
    %14 = vector.multi_reduction <maximumf>, %13, %cst_7 [2] : vector<2x8x8xf32> to vector<2x8xf32>
    %15 = vector.shape_cast %14 : vector<2x8xf32> to vector<2x8x1xf32>
    %16 = vector.broadcast %15 : vector<2x8x1xf32> to vector<2x8x8xf32>
    %17 = arith.subf %13, %16 : vector<2x8x8xf32>
    %18 = math.exp %17 : vector<2x8x8xf32>
    %cst_8 = arith.constant dense<0.000000e+00> : vector<2x8xf32>
    %19 = vector.multi_reduction <add>, %18, %cst_8 [2] : vector<2x8x8xf32> to vector<2x8xf32>
    %20 = vector.shape_cast %19 : vector<2x8xf32> to vector<2x8x1xf32>
    %21 = tpu.reciprocal %20 {approx = true} : vector<2x8x1xf32> -> vector<2x8x1xf32>
    %22 = vector.broadcast %21 : vector<2x8x1xf32> to vector<2x8x8xf32>
    %23 = arith.mulf %18, %22 : vector<2x8x8xf32>
    "tpu.trace_start"() <{level = 10 : i32, message = "bqk,bkd->bqd"}> : () -> ()
    %cst_9 = arith.constant dense<0.000000e+00> : vector<2x8x32xf32>
    %24 = tpu.matmul %23, %12, %cst_9 {dimension_numbers = #tpu.dot_dimension_numbers<[2], [1], [1], [2], [0, 0, 0, 1, 1, 2], [0], [0]>} : vector<2x8x8xf32>, vector<2x8x32xf32>, vector<2x8x32xf32> -> vector<2x8x32xf32>
    "tpu.trace_stop"() : () -> ()
    %cst_10 = arith.constant dense<0.000000e+00> : vector<2x32xf32>
    %25 = vector.multi_reduction <add>, %24, %cst_10 [1] : vector<2x8x32xf32> to vector<2x32xf32>
    %cst_11 = arith.constant 8.000000e+00 : f32
    %26 = vector.broadcast %cst_11 : f32 to vector<2x32xf32>
    %27 = arith.divf %25, %26 : vector<2x32xf32>
    %c0_12 = arith.constant 0 : index
    %c0_13 = arith.constant 0 : index
    %28 = vector.load %arg4[%c0_12, %c0_13] : memref<32x32xf32, #tpu.memory_space<vmem>>, vector<32x32xf32>
    %cst_14 = arith.constant dense<0.000000e+00> : vector<2x32xf32>
    %29 = tpu.matmul %27, %28, %cst_14 {dimension_numbers = #tpu.dot_dimension_numbers<[1], [0], [0], [1], [0, 0, 1, 1], [], []>} : vector<2x32xf32>, vector<32x32xf32>, vector<2x32xf32> -> vector<2x32xf32>
    %c0_15 = arith.constant 0 : index
    %c0_16 = arith.constant 0 : index
    %30 = vector.load %arg5[%c0_15, %c0_16] : memref<1x32xf32, #tpu.memory_space<vmem>>, vector<1x32xf32>
    %31 = vector.broadcast %30 : vector<1x32xf32> to vector<2x32xf32>
    %32 = arith.addf %29, %31 : vector<2x32xf32>
    %c0_17 = arith.constant 0 : index
    %c0_18 = arith.constant 0 : index
    %33 = vector.load %arg6[%c0_17, %c0_18] : memref<2x32xf32, #tpu.memory_space<vmem>>, vector<2x32xf32>
    tpu.vector_store %arg6[%c0_17, %c0_18], %32 {strides = array<i32>} : memref<2x32xf32, #tpu.memory_space<vmem>>, vector<2x32xf32>,
    return
  }
  func.func @transform_0(%arg0: i32) -> (i32, i32, i32) {
    %c0_i32 = arith.constant 0 : i32
    %c0_i32_0 = arith.constant 0 : i32
    %c0_i32_1 = arith.constant 0 : i32
    return %arg0, %c0_i32, %c0_i32_0 : i32, i32, i32
  }
  func.func @transform_1(%arg0: i32) -> (i32, i32) {
    %c0_i32 = arith.constant 0 : i32
    %c0_i32_0 = arith.constant 0 : i32
    %c0_i32_1 = arith.constant 0 : i32
    return %c0_i32, %c0_i32_0 : i32, i32
  }
  func.func @transform_2(%arg0: i32) -> (i32, i32) {
    %c0_i32 = arith.constant 0 : i32
    %c0_i32_0 = arith.constant 0 : i32
    %c0_i32_1 = arith.constant 0 : i32
    return %c0_i32, %c0_i32_0 : i32, i32
  }
  func.func @transform_3(%arg0: i32) -> (i32, i32) {
    %c0_i32 = arith.constant 0 : i32
    %c0_i32_0 = arith.constant 0 : i32
    %c0_i32_1 = arith.constant 0 : i32
    return %c0_i32, %c0_i32_0 : i32, i32
  }
  func.func @transform_4(%arg0: i32) -> (i32, i32) {
    %c0_i32 = arith.constant 0 : i32
    %c0_i32_0 = arith.constant 0 : i32
    %c0_i32_1 = arith.constant 0 : i32
    return %c0_i32, %c0_i32_0 : i32, i32
  }
  func.func @transform_5(%arg0: i32) -> (i32, i32) {
    %c0_i32 = arith.constant 0 : i32
    %c0_i32_0 = arith.constant 0 : i32
    return %arg0, %c0_i32 : i32, i32
  }
}

</mosaic_0001>

<bundles_post_ra>
// kernel: tpu_custom_call.1
= control target key start
LH: loop header
LB: loop body
LE: loop exit
PB: predicated region body
PF: predicated region fallthrough
CT: control target
= control target key end

     0   :  { %10 = vsyncpa [#allocation3], 0  ;;  %s938_s0 = inlined_call_operand.hbm [shape: f32[2,8,32], index: 0, kind: input, shape index: {}]   ;;  %s939_s1 = inlined_call_operand.hbm [shape: f32[32,96], index: 1, kind: input, shape index: {}]   ;;  %s940_s2 = inlined_call_operand.vmem [shape: f32[1,96], index: 2, kind: input, shape index: {}]   ;;  %s941_s3 = inlined_call_operand.hbm [shape: f32[32,32], index: 3, kind: input, shape index: {}]   ;;  %s942_s4 = inlined_call_operand.vmem [shape: f32[1,32], index: 4, kind: input, shape index: {}]   ;;  %s943_s5 = inlined_call_operand.hbm [shape: f32[2,32], index: 5, kind: output, shape index: {}]  }
   0x1   :  { %11 = vsyncpa [#allocation6], 0 }
   0x2   :  { %12 = vsyncpa [#allocation4], 0  ;;  %s807_s18 = smov [#allocation5]   ;;  %s808_s20 = smov [#allocation2]  }
   0x3   :  { %s30_s19 = sshll.u32 %s807_s18, 4  ;;  %s18_s21 = sshll.u32 %s808_s20, 4  ;;  %s31_s19 = int_to_ptr.vmem [resolvable:$true] %s30_s19  ;;  %s848_s21 = int_to_ptr.vmem [resolvable:$true] %s18_s21 }
   0x4   :  { %s713_s24 = scalar_lea.hbm %s939_s1, 512 }
   0x5   :  { %p714_p0 = scmp.ne.s32.totalorder %s939_s1, %s713_s24  ;;  %p717_p1 = scmp.lt.u32.totalorder %s713_s24, %s939_s1 }
   0x7   :  { %p719_p2 = pnand %p717_p1, %p714_p0 }
   0x9   :  { %722 = shalt.err (!%p719_p2)
}
   0xa   :  { %s723_s29 = scalar_lea.vmem %s31_s19, 512  ;;  %p728_p4 = scmp.lt.s32.totalorder %s31_s19, %s31_s19 }
   0xb   :  { %p724_p3 = scmp.ne.s32.totalorder %s31_s19, %s723_s29  ;;  %p729_p5 = scmp.lt.s32.totalorder %s723_s29, %s723_s29 }
   0xd   :  { %p730_p6 = por %p729_p5, %p728_p4 }
   0xf   :  { %p731_p7 = pnand %p730_p6, %p724_p3 }
  0x11   :  { %734 = shalt.err (!%p731_p7)
}
  0x12   :  { %s809_s30 = smov 128   ;;  %s810_s6 = smov 8  }
  0x13   :  { %36 = dma.hbm_to_vmem [thread:$0]  %s939_s1, 512, %s31_s19, [#allocation6], %s809_s30, %s809_s30, %s810_s6  }
  0x14   :  { %s735_s11 = scalar_lea.hbm %s938_s0, 256 }
  0x15   :  { %p736_p8 = scmp.ne.s32.totalorder %s938_s0, %s735_s11  ;;  %p739_p9 = scmp.lt.u32.totalorder %s735_s11, %s938_s0 }
  0x17   :  { %p741_p10 = pnand %p739_p9, %p736_p8 }
  0x19   :  { %744 = shalt.err (!%p741_p10)
}
  0x1a   :  { %s745_s16 = scalar_lea.vmem %s848_s21, 256  ;;  %p750_p12 = scmp.lt.s32.totalorder %s848_s21, %s848_s21 }
  0x1b   :  { %p746_p11 = scmp.ne.s32.totalorder %s848_s21, %s745_s16  ;;  %p751_p13 = scmp.lt.s32.totalorder %s745_s16, %s745_s16 }
  0x1d   :  { %p752_p0 = por %p751_p13, %p750_p12 }
  0x1f   :  { %p753_p1 = pnand %p752_p0, %p746_p11 }
  0x21   :  { %756 = shalt.err (!%p753_p1)
}
  0x22   :  { %24 = dma.hbm_to_vmem [thread:$0]  %s938_s0, 256, %s848_s21, [#allocation3], %s809_s30, %s809_s30, %s810_s6  }
  0x23   :  { %s811_s18 = smov [#allocation7]   ;;  %s757_s23 = scalar_lea.hbm %s941_s3, 512 }
  0x24   :  { %s44_s19 = sshll.u32 %s811_s18, 4  ;;  %p758_p2 = scmp.ne.s32.totalorder %s941_s3, %s757_s23  ;;  %s45_s19 = int_to_ptr.vmem [resolvable:$true] %s44_s19 }
  0x25   :  { %p761_p3 = scmp.lt.u32.totalorder %s757_s23, %s941_s3 }
  0x27   :  { %p763_p4 = pnand %p761_p3, %p758_p2 }
  0x29   :  { %766 = shalt.err (!%p763_p4)
}
  0x2a   :  { %s767_s28 = scalar_lea.vmem %s45_s19, 512  ;;  %p772_p6 = scmp.lt.s32.totalorder %s45_s19, %s45_s19 }
  0x2b   :  { %p768_p5 = scmp.ne.s32.totalorder %s45_s19, %s767_s28  ;;  %p773_p7 = scmp.lt.s32.totalorder %s767_s28, %s767_s28 }
  0x2d   :  { %p774_p8 = por %p773_p7, %p772_p6 }
  0x2f   :  { %p775_p9 = pnand %p774_p8, %p768_p5 }
  0x31   :  { %778 = shalt.err (!%p775_p9)
}
  0x32   :  { %50 = dma.hbm_to_vmem [thread:$0]  %s941_s3, 512, %s45_s19, [#allocation6], %s809_s30, %s809_s30, %s810_s6  }
  0x33   :  { %801 = dma.done.wait [#allocation3], 256  }
  0x34   :  { %802 = vsyncadd [#allocation3], 4294967040 }
  0x35   :  { %803 = dma.done.wait [#allocation6], 1024  }
  0x36   :  { %804 = vsyncadd [#allocation6], 4294966272  ;;  %vm75_vm0 = vcmask 261120   ;;  %v64_v0 = vld [vmem:[#allocation5] sm:$0xff]  ;;  %v65_v1 = vld [vmem:[#allocation5 + $0x8] sm:$0xff]  ;;  %v812_v8 = vmov 0.0  }
  0x37   :  { %v66_v2 = vld [vmem:[#allocation5 + $0x10] sm:$0xff]  ;;  %v680_v3 = vpack.c.bf16 %v65_v1, %v64_v0  ;;  %v67_v4 = vld [vmem:[#allocation5 + $0x18] sm:$0xff]  ;;  %649 = vmatprep.subr.mxu1 %v812_v8  ;;  %vm813_vm1 = vmmov 0   ;;  %s814_s30 = smov 96   ;;  %vm311_vm2 = vcmask 64512   ;;  %v503_v40 = vld [vmem:[#allocation7] sm:$0xff] }
  0x38   :  { %v62_v5 = vld [vmem:[#allocation2] sm:$0xff]  ;;  %v684_v6 = vpack.c.bf16 %v67_v4, %v66_v2  ;;  %v63_v7 = vld [vmem:[#allocation2 + $0x8] sm:$0xff]  ;;  %651 = vmatprep.mubr.msk.f32.mxu1 %vm813_vm1, %v812_v8  ;;  %v504_v41 = vld [vmem:[#allocation7 + $0x8] sm:$0xff]  ;;  %v816_v43 = vmov 0.0|0.0   ;;  %vm516_vm3 = vcmask 1041409   ;;  %s817_s8 = smov [#allocation8]  }
  0x39   :  { %646 = vmatprep.mubr.msk.f32.mxu0 %vm75_vm0, %v62_v5  ;;  %681 = vmatprep.subr.bf16.mxu0 %v680_v3  ;;  %v608_v9 = vld [vmem:[%s940_s2] ss:$0 sm:$0xff]  ;;  %s815_s2 = smov 64   ;;  %v689_v42 = vpack.c.bf16 %v504_v41, %v503_v40  ;;  %v506_v45 = vld [vmem:[#allocation7 + $0x18] sm:$0xff]  ;;  %s598_s9 = sshll.u32 %s817_s8, 4  ;;  %vm590_vm4 = vcmask 254976   ;;  %s599_s9 = int_to_ptr.vmem [resolvable:$true] %s598_s9 }
  0x3a   :  { %683 = vmatpush3.bf16.msra.mxu0 %v680_v3  ;;  %v505_v44 = vld [vmem:[#allocation7 + $0x10] sm:$0xff]  ;;  %s779_s10 = scalar_lea.vmem %s599_s9, 32  ;;  %p784_p11 = scmp.lt.s32.totalorder %s599_s9, %s599_s9 }
  0x3b   :  { %685 = vmatprep.subr.bf16.mxu0 %v684_v6  ;;  %v692_v46 = vpack.c.bf16 %v506_v45, %v505_v44  ;;  %v617_v4 = vld [vmem:[%s942_s4] ss:$0 sm:$0xff]  ;;  %p780_p10 = scmp.ne.s32.totalorder %s599_s9, %s779_s10  ;;  %p785_p12 = scmp.lt.s32.totalorder %s779_s10, %s779_s10 }
  0x3d   :  { %p786_p13 = por %p785_p12, %p784_p11 }
  0x3e   :  { %687 = vmatpush3.bf16.msra.mxu0 %v684_v6 }
  0x3f   :  { %688 = vmatprep.subr.bf16.mxu0 %v816_v43  ;;  %p787_p0 = pnand %p786_p13, %p780_p10 }
  0x41   :  { %647 = vmatmul.mubr.msk.f32.vlgmr.msra.gmra.mrb[0].mxu0 %vm75_vm0, %v63_v7 }
  0x42   :  { %677 = vmatprep.mubr.msk.f32.mxu0 %vm813_vm1, %v812_v8  ;;  %690 = vmatpush3.bf16.msra.mxu0 %v689_v42 }
  0x43   :  { %691 = vmatprep.subr.bf16.mxu0 %v816_v43 }
  0x46   :  { %693 = vmatpush3.bf16.msra.mxu0 %v692_v46 }
 0x114   :  { %v648_v10 = vpop.f32.mrb[0].mxu0 }
 0x115   :  { %v148_v11 = vpop.f32.mrb[1].mxu0  ;;  %v154_v13 = vadd.f32 %v648_v10, %v608_v9 }
 0x116   :  { %v149_v12 = vadd.f32 %v608_v9, %v148_v11 }
 0x118   :  { %158 = vrot.lane.b32.xlu0 %v149_v12, %s814_s30 }
 0x11c   :  { %235 = vrot.lane.b32.xlu0 %v154_v13, %s814_s30 }
 0x18a   :  { %v159_v14 = vpop.permute.xlu0 %158 }
 0x18b   :  { %650 = vmatpush3.xpose.msk.msra.mxu1 %vm75_vm0, %v159_v14 }
 0x18c   :  { %654 = vmatprep.subr.mxu1 %v812_v8 }
 0x18e   :  { %652 = vmatmul.mubr.msk.f32.vlgmr.msra.gmra.mrb[0].mxu1 %vm75_vm0, %v149_v12  ;;  %v236_v15 = vpop.permute.xlu0 %235 }
 0x18f   :  { %655 = vmatpush3.xpose.msk.msra.mxu1 %vm75_vm0, %v236_v15  ;;  %656 = vmatprep.mubr.msk.f32.mxu1 %vm813_vm1, %v812_v8 }
 0x190   :  { %659 = vmatprep.subr.mxu1 %v812_v8 }
 0x192   :  { %657 = vmatmul.mubr.msk.f32.vlgmr.msra.gmra.mrb[2].mxu1 %vm75_vm0, %v154_v13 }
 0x193   :  { %661 = vmatprep.mubr.msk.f32.mxu1 %vm813_vm1, %v812_v8 }
 0x261   :  { %v230_v16 = vpop.f32.mrb[0].mxu1 }
 0x262   :  { %v653_v17 = vpop.f32.mrb[1].mxu1  ;;  %v312_v18 = vsel %vm311_vm2, %v230_v16, -inf }
 0x263   :  { %313 = vmax.xlane.f32.xlu1 %v312_v18 }
 0x265   :  { %v307_v19 = vpop.f32.mrb[2].mxu1 }
 0x266   :  { %v658_v20 = vpop.f32.mrb[3].mxu1  ;;  %v315_v21 = vsel %vm311_vm2, %v307_v19, -inf }
 0x267   :  { %316 = vmax.xlane.f32.xlu1 %v315_v21 }
 0x278   :  { %334 = vrot.lane.b32.xlu1 %v149_v12, %s815_s2 }
 0x2f0   :  { %v314_v22 = vpop.xlane.xlu1 %313 }
 0x2f1   :  { %v318_v23 = vsub.f32 %v230_v16, %v314_v22 }
 0x2f3   :  { %v320_v24 = vmul.f32 1.442695, %v318_v23 }
 0x2f4   :  { %v317_v25 = vpop.xlane.xlu1 %316 }
 0x2f5   :  { %705 = vpow2.f32 %v320_v24  ;;  %v319_v26 = vsub.f32 %v307_v19, %v317_v25 }
 0x2f7   :  { %v322_v27 = vmul.f32 1.442695, %v319_v26 }
 0x2f8   :  { %v335_v28 = vpop.permute.xlu1 %334 }
 0x2f9   :  { %707 = vpow2.f32 %v322_v27  ;;  %660 = vmatpush3.msra.mxu1 %v335_v28 }
 0x2fa   :  { %664 = vmatprep.subr.mxu1 %v812_v8 }
 0x2ff   :  { %v706_v29 = vpop.eup %705 }
 0x300   :  { %v324_v30 = vsel %vm311_vm2, %v706_v29, 0.0 }
 0x301   :  { %325 = vadd.xlane.f32.xlu0 %v324_v30 }
 0x303   :  { %v708_v31 = vpop.eup %707 }
 0x304   :  { %v327_v32 = vsel %vm311_vm2, %v708_v31, 0.0 }
 0x305   :  { %328 = vadd.xlane.f32.xlu1 %v327_v32 }
 0x316   :  { %410 = vrot.lane.b32.xlu1 %v154_v13, %s815_s2 }
 0x38e   :  { %v326_v33 = vpop.xlane.xlu0 %325 }
 0x38f   :  { %709 = vrcp.f32 %v326_v33 }
 0x392   :  { %v329_v34 = vpop.xlane.xlu1 %328 }
 0x393   :  { %711 = vrcp.f32 %v329_v34 }
 0x396   :  { %v411_v37 = vpop.permute.xlu1 %410 }
 0x399   :  { %v710_v35 = vpop.eup %709 }
 0x39a   :  { %v332_v36 = vmul.f32 %v710_v35, %v706_v29 }
 0x39c   :  { %662 = vmatmul.mubr.msk.f32.vlgmr.msra.gmra.mrb[4].mxu1 %vm311_vm2, %v332_v36 }
 0x39d   :  { %v712_v38 = vpop.eup %711  ;;  %665 = vmatpush3.msra.mxu1 %v411_v37  ;;  %666 = vmatprep.mubr.msk.f32.mxu1 %vm813_vm1, %v812_v8 }
 0x39e   :  { %v333_v39 = vmul.f32 %v712_v38, %v708_v31 }
 0x3a0   :  { %667 = vmatmul.mubr.msk.f32.vlgmr.msra.gmra.mrb[6].mxu1 %vm311_vm2, %v333_v39 }
 0x46f   :  { %v406_v47 = vpop.f32.mrb[4].mxu1 }
 0x470   :  { %v486_v48 = vsel %vm75_vm0, %v406_v47, 0.0  ;;  %v663_v49 = vpop.f32.mrb[5].mxu1 }
 0x471   :  { %v487_v50 = vrot.slane %v486_v48, 4 }
 0x473   :  { %v488_v51 = vadd.f32 %v487_v50, %v486_v48  ;;  %v482_v52 = vpop.f32.mrb[6].mxu1 }
 0x474   :  { %v493_v53 = vsel %vm75_vm0, %v482_v52, 0.0  ;;  %v668_v54 = vpop.f32.mrb[7].mxu1 }
 0x475   :  { %v489_v55 = vrot.slane %v488_v51, 2  ;;  %v494_v56 = vrot.slane %v493_v53, 4 }
 0x477   :  { %v490_v57 = vadd.f32 %v489_v55, %v488_v51  ;;  %v495_v58 = vadd.f32 %v494_v56, %v493_v53 }
 0x479   :  { %v491_v59 = vrot.slane %v490_v57, 1  ;;  %v496_v60 = vrot.slane %v495_v58, 2 }
 0x47b   :  { %v497_v61 = vadd.f32 %v496_v60, %v495_v58  ;;  %v492_v62 = vadd.f32 %v491_v59, %v490_v57 }
 0x47d   :  { %v498_v63 = vrot.slane %v497_v61, 1  ;;  %v501_v1 = vmul.f32 0.125, %v492_v62 }
 0x47f   :  { %v499_v0 = vadd.f32 %v498_v63, %v497_v61 }
 0x481   :  { %v502_v2 = vmul.f32 0.125, %v499_v0 }
 0x483   :  { %v517_v3 = vsel %vm516_vm3, %v502_v2, %v501_v1 }
 0x484   :  { %678 = vmatmul.mubr.msk.f32.vlgmr.msra.gmra.mrb[2].mxu0 %vm75_vm0, %v517_v3 }
 0x557   :  { %v586_v5 = vpop.f32.mrb[2].mxu0 }
 0x558   :  { %v587_v6 = vadd.f32 %v617_v4, %v586_v5  ;;  %v679_v7 = vpop.f32.mrb[3].mxu0 }
 0x55a   :  { %591 = vst.msk [vmem:[#allocation8] sm:$0x3] %vm590_vm4, %v587_v6 }
 0x55b   :  { %790 = shalt.err (!%p787_p0)
}
 0x55c   :  { %s791_s13 = scalar_lea.hbm %s943_s5, 32 }
 0x55d   :  { %p792_p1 = scmp.ne.s32.totalorder %s943_s5, %s791_s13  ;;  %p795_p2 = scmp.lt.u32.totalorder %s791_s13, %s943_s5 }
 0x55f   :  { %p797_p3 = pnand %p795_p2, %p792_p1 }
 0x561   :  { %800 = shalt.err (!%p797_p3)
}
 0x562   :  { %601 = dma.vmem_to_hbm [thread:$0]  %s599_s9, 32, %s943_s5, [#allocation4]  }
 0x563   :  { %805 = dma.done.wait [#allocation4], 32  }
 0x564   :  { %806 = vsyncadd [#allocation4], 4294967264 }
 0x565   :  { %605 = vsyncpa [#allocation3], 1 }
 0x566   :  { %606 = vsyncpa [#allocation6], 1 }
 0x567   :  { %607 = vsyncpa [#allocation4], 1 }

</bundles_post_ra>
